<compile_context>
chip_gen: v7x
topology: tpu7x:2x2x1
jax: 0.10.0
libtpu: 0.0.40
codegen_flags: <defaults>
</compile_context>

<pallas_src>
import jax
import jax.numpy as jnp
from jax.experimental import pallas as pl
from jax.experimental.pallas import tpu as pltpu


def bag_kernel(x_ref, w_ref, o_ref):
    # x_ref : (C, Tt)      input audio tile for one batch element (batch squeezed)
    # w_ref : (S*C, C)     folded, pre-normalized bag weights
    # o_ref : (S*C, Tt)    weighted-average source estimates (flattened sources)
    x = x_ref[...]                      # (C, Tt) f32
    w = w_ref[...]                      # (SC, C) f32
    C = x.shape[0]

    # acc[sc, t] = sum_o w[sc, o] * x[o, t]  — contraction depth C (=2) stays on
    # the VPU: lane-broadcast of w columns, sublane-broadcast of x rows.
    acc = w[:, 0:1] * x[0:1, :]
    for o in range(1, C):               # static, tiny trip count
        acc = acc + w[:, o:o + 1] * x[o:o + 1, :]

    # Single full-tile store, cast fused into the store expression.
    o_ref[...] = acc.astype(o_ref.dtype)


def bag_of_models_apply(x, model_weights, bag_weights, *, t_tile=2048):
    """x: (B, C, T) f32; model_weights: (N, S, C, C); bag_weights: (N, S).
    Returns (B, S, C, T) weighted-average source estimates."""
    B, C, T = x.shape
    N, S, Cw, Cw2 = model_weights.shape
    assert Cw == C and Cw2 == C
    assert bag_weights.shape == (N, S)

    # ---- Fold bag weighting + normalization into one (S*C, C) weight (wrapper) ----
    mw = bag_weights.astype(jnp.float32)                      # (N, S)
    totals = mw.sum(axis=0)                                   # (S,)  (zero total -> inf/nan, same as PyTorch contract)
    w_eff = jnp.einsum("ns,nsco->sco", mw, model_weights.astype(jnp.float32))
    w_eff = w_eff / totals[:, None, None]                     # (S, C, C)
    w2d = w_eff.reshape(S * C, C)                             # (S*C, C)

    # ---- Time tiling: 128-aligned tile, pad T up to a multiple of it ----
    t_tile = max(128, min(t_tile, pl.cdiv(T, 128) * 128))
    T_pad = pl.cdiv(T, t_tile) * t_tile
    x_pad = x.astype(jnp.float32)
    if T_pad != T:
        x_pad = jnp.pad(x_pad, ((0, 0), (0, 0), (0, T_pad - T)))

    grid = (B, T_pad // t_tile)

    out = pl.pallas_call(
        bag_kernel,
        out_shape=jax.ShapeDtypeStruct((B, S * C, T_pad), jnp.float32),
        grid_spec=pltpu.PrefetchScalarGridSpec(
            num_scalar_prefetch=0,
            grid=grid,
            in_specs=[
                # batch dim squeezed out of the kernel view
                pl.BlockSpec((pl.Squeezed(), C, t_tile), lambda b, t: (b, 0, t)),
                # tiny folded weight, same block every step
                pl.BlockSpec((S * C, C), lambda b, t: (0, 0)),
            ],
            out_specs=pl.BlockSpec((pl.Squeezed(), S * C, t_tile),
                                   lambda b, t: (b, 0, t)),
        ),
        compiler_params=pltpu.CompilerParams(
            dimension_semantics=("parallel", "parallel")),
    )(x_pad, w2d)

    return out[:, :, :T].reshape(B, S, C, T)


def reference(x, model_weights, bag_weights):
    y = jnp.einsum("nsco,bot->bnsct", model_weights, x)
    weighted = (bag_weights[None, :, :, None, None] * y).sum(axis=1)
    totals = bag_weights.sum(axis=0)
    return weighted / totals[None, :, None, None]


if __name__ == "__main__":
    key = jax.random.PRNGKey(0)
    kx, kw = jax.random.split(key)

    # Demucs-like defaults at small scale: stereo audio, 4 sources, 2 models in bag.
    B, C, T = 2, 2, 3000         # batch, audio_channels, time (non-multiple of 128)
    N, S = 2, 4                  # num models in bag, num sources

    x = jax.random.normal(kx, (B, C, T), dtype=jnp.float32)
    model_weights = jax.random.normal(kw, (N, S, C, C), dtype=jnp.float32) * 0.5
    # BagOfModels.weights: list of N lists of S floats (deterministic, non-uniform)
    bag_weights = jnp.array([[1.0, 2.0, 0.5, 1.5],
                             [0.25, 1.0, 2.0, 1.0]], dtype=jnp.float32)

    out = bag_of_models_apply(x, model_weights, bag_weights)
    out = jax.block_until_ready(out)

    ref = reference(x, model_weights, bag_weights)
    assert out.shape == (B, S, C, T)
    assert jnp.allclose(out, ref, atol=1e-4, rtol=1e-5)

    print("KERNEL_OK")
</pallas_src>

<mosaic_0001>
module attributes {stable_mosaic.version = 11 : i64} {
  func.func @bag_kernel(%arg0: i32, %arg1: i32, %arg2: memref<1x2x2048xf32, #tpu.memory_space<vmem>>, %arg3: memref<8x2xf32, #tpu.memory_space<vmem>>, %arg4: memref<1x8x2048xf32, #tpu.memory_space<vmem>>) attributes {dimension_semantics = [#tpu.dimension_semantics<parallel>, #tpu.dimension_semantics<parallel>], iteration_bounds = array<i64: 2, 2>, scalar_prefetch = 0 : i64, scratch_operands = 0 : i64, tpu.core_type = #tpu.core_type<tc>, window_params = [{transform_indices = @transform_0, window_bounds = array<i64: 1, 2, 2048>}, {pipeline_mode = #tpu.pipeline_mode<synchronous>, transform_indices = @transform_1, window_bounds = array<i64: 8, 2>}, {transform_indices = @transform_2, window_bounds = array<i64: 1, 8, 2048>}]} {
    %c0 = arith.constant 0 : index
    %c0_0 = arith.constant 0 : index
    %c0_1 = arith.constant 0 : index
    %0 = vector.load %arg2[%c0, %c0_0, %c0_1] : memref<1x2x2048xf32, #tpu.memory_space<vmem>>, vector<1x2x2048xf32>
    %1 = vector.shape_cast %0 : vector<1x2x2048xf32> to vector<2x2048xf32>
    %c0_2 = arith.constant 0 : index
    %c0_3 = arith.constant 0 : index
    %2 = vector.load %arg3[%c0_2, %c0_3] : memref<8x2xf32, #tpu.memory_space<vmem>>, vector<8x2xf32>
    %3 = vector.extract_strided_slice %2 {offsets = [0, 0], sizes = [8, 1], strides = [1, 1]} : vector<8x2xf32> to vector<8x1xf32>
    %4 = vector.extract_strided_slice %1 {offsets = [0, 0], sizes = [1, 2048], strides = [1, 1]} : vector<2x2048xf32> to vector<1x2048xf32>
    %5 = vector.broadcast %3 : vector<8x1xf32> to vector<8x2048xf32>
    %6 = vector.broadcast %4 : vector<1x2048xf32> to vector<8x2048xf32>
    %7 = arith.mulf %5, %6 : vector<8x2048xf32>
    %8 = vector.extract_strided_slice %2 {offsets = [0, 1], sizes = [8, 1], strides = [1, 1]} : vector<8x2xf32> to vector<8x1xf32>
    %9 = vector.extract_strided_slice %1 {offsets = [1, 0], sizes = [1, 2048], strides = [1, 1]} : vector<2x2048xf32> to vector<1x2048xf32>
    %10 = vector.broadcast %8 : vector<8x1xf32> to vector<8x2048xf32>
    %11 = vector.broadcast %9 : vector<1x2048xf32> to vector<8x2048xf32>
    %12 = arith.mulf %10, %11 : vector<8x2048xf32>
    %13 = arith.addf %7, %12 : vector<8x2048xf32>
    %c0_4 = arith.constant 0 : index
    %c0_5 = arith.constant 0 : index
    %c0_6 = arith.constant 0 : index
    %14 = vector.load %arg4[%c0_4, %c0_5, %c0_6] : memref<1x8x2048xf32, #tpu.memory_space<vmem>>, vector<1x8x2048xf32>
    %15 = vector.shape_cast %14 : vector<1x8x2048xf32> to vector<8x2048xf32>
    %16 = vector.shape_cast %13 : vector<8x2048xf32> to vector<1x8x2048xf32>
    tpu.vector_store %arg4[%c0_4, %c0_5, %c0_6], %16 {strides = array<i32>} : memref<1x8x2048xf32, #tpu.memory_space<vmem>>, vector<1x8x2048xf32>,
    return
  }
  func.func @transform_0(%arg0: i32, %arg1: i32) -> (i32, i32, i32) {
    %c0_i32 = arith.constant 0 : i32
    %c0_i32_0 = arith.constant 0 : i32
    return %arg0, %c0_i32, %arg1 : i32, i32, i32
  }
  func.func @transform_1(%arg0: i32, %arg1: i32) -> (i32, i32) {
    %c0_i32 = arith.constant 0 : i32
    %c0_i32_0 = arith.constant 0 : i32
    %c0_i32_1 = arith.constant 0 : i32
    return %c0_i32, %c0_i32_0 : i32, i32
  }
  func.func @transform_2(%arg0: i32, %arg1: i32) -> (i32, i32, i32) {
    %c0_i32 = arith.constant 0 : i32
    %c0_i32_0 = arith.constant 0 : i32
    return %arg0, %c0_i32, %arg1 : i32, i32, i32
  }
}

</mosaic_0001>

<bundles_post_ra>
// kernel: tpu_custom_call.1
= control target key start
LH: loop header
LB: loop body
LE: loop exit
PB: predicated region body
PF: predicated region fallthrough
CT: control target
= control target key end

     0   :  { %7 = vsyncpa [#allocation3], 0  ;;  %s1194_s0 = inlined_call_operand.hbm [shape: f32[2,2,4096], index: 0, kind: input, shape index: {}]   ;;  %s1195_s1 = inlined_call_operand.vmem [shape: f32[8,2], index: 1, kind: input, shape index: {}]   ;;  %s1196_s2 = inlined_call_operand.hbm [shape: f32[2,8,4096], index: 2, kind: output, shape index: {}]  }
   0x1   :  { %9 = vsyncpa [#allocation3 + $0x1], 0 }
   0x2   :  { %10 = vsyncpa [#allocation4], 0 }
   0x3   :  { %12 = vsyncpa [#allocation4 + $0x1], 0  ;;  %s902_s9 = smov 0   ;;  %s904_s10 = smov 0  }
   0x4   :  { %s906_s11 = smov 0   ;;  %s908_s12 = smov 0  }
   0x5   :  { %s910_s13 = smov 0   ;;  %s912_s14 = smov 0  }
   0x6   :  { %s914_s15 = smov 0   ;;  %s916_s16 = smov 0  }
   0x7 LB: > { %s654_s17 = sadd.s32 4294967295, %s881_s16   ;;  %s655_s18 = sadd.s32 4294967294, %s881_s16   ;;  %s881_s16 = sphi %s916_s16, %s18_s16   ;;  %s877_s15 = sphi %s914_s15, %s1213_s15   ;;  %s873_s14 = sphi %s912_s14, %s1212_s14   ;;  %s869_s13 = sphi %s910_s13, %s1211_s13   ;;  %s865_s12 = sphi %s908_s12, %s1210_s12   ;;  %s861_s11 = sphi %s906_s11, %s1209_s11   ;;  %s857_s10 = sphi %s904_s10, %s1208_s10   ;;  %s853_s9 = sphi %s902_s9, %s1207_s9  }
   0x8   : > { %s27_s19 = sadd.s32 1, %s873_s14  ;;  %s30_s20 = sadd.s32 1, %s877_s15 }
   0x9   : > { %p28_p0 = scmp.ge.s32.totalorder %s27_s19, 2  ;;  %s39_s21 = sadd.s32 1, %s861_s11 }
   0xa   : > { %p46_p1 = scmp.ne.s32.totalorder %s861_s11, %s857_s10  ;;  %p47_p2 = scmp.eq.s32.totalorder %s881_s16, 0 }
   0xb   : > { %s1215_s19 = smov (%p28_p0, %s27_s19), 0  ;;  %s1217_s20 = smov (!%p28_p0, %s30_s20), %s877_s15 }
   0xc   : > { %s35_s22 = ssub.s32 %s873_s14, %s1215_s19  ;;  %p955_p3 = por %p47_p2, %p46_p1 }
   0xd   : > { %p32_p4 = scmp.ge.s32.totalorder %s1217_s20, 2  ;;  %p52_p5 = scmp.ne.s32.totalorder %s857_s10, %s853_s9 }
   0xe   : > { %p53_p6 = scmp.eq.s32.totalorder %s654_s17, 0  ;;  %p99_p7 = scmp.eq.s32.totalorder %s654_s17, 3 }
   0xf   : > { %s1219_s20 = smov (%p32_p4, %s1217_s20), 0  ;;  %p105_p10 = scmp.eq.s32.totalorder %s655_s18, 3 }
  0x10   : > { %p963_p8 = por %p53_p6, %p52_p5  ;;  %p967_p9 = por %p99_p7, %p46_p1 }
  0x11   : > { %s34_s26 = ssub.s32 %s877_s15, %s1219_s20  ;;  %p973_p12 = por %p105_p10, %p52_p5 }
  0x12   : > { %s1200_s25 = scalar_select %p967_p9, 1, 0 }
  0x13   : > { %s36_s27 = sor.u32 %s35_s22, %s34_s26  ;;  %p683_p13 = scmp.lt.s32.totalorder %s881_s16, 4 }
  0x14   : > { %p37_p11 = scmp.eq.s32.totalorder %s36_s27, 0  ;;  %s128_s29 = sand.u32 1, %s861_s11  }
  0x15   : > { %s1201_s28 = scalar_select %p973_p12, 1, 0 }
  0x16   : > { %s980_s30 = scalar_select %p37_p11, %s861_s11, %s39_s21  }
  0x17   : > { %s658_s3 = sshll.u32 %s128_s29, 5  ;;  %s659_s4 = sshll.u32 %s873_s14, 4 }
  0x18   : > { %s660_s5 = sshll.u32 %s877_s15, 5  ;;  %s132_s6 = scalar_lea.vmem [#allocation2], %s658_s3 }
  0x19   : > { %s142_s7 = sshll.u32 %s132_s6, 4  ;;  %s138_s8 = sadd.s32 %s660_s5, %s659_s4  ;;  %s984_s7 = int_to_ptr.vmem [resolvable:$true] %s142_s7 }
  0x1a   : > { %s661_s17 = sshll.u32 %s138_s8, 5  ;;  %p988_p0 = pnand %p683_p13, %p955_p3 }
  0x1b   : > { %s995_s21 = scalar_lea.hbm %s1194_s0, %s661_s17  ;;  %s129_s27 = scalar_lea.sflag [#allocation3], %s128_s29 }
  0x1c   : > { %s753_s3 = scalar_lea.hbm %s995_s21, 512  ;;  %p755_p3 = pneg %p988_p0 }
  0x1d   : > { %p754_p4 = scmp.ne.s32.totalorder %s995_s21, %s753_s3  ;;  %s758_s5 = scalar_lea.hbm %s1194_s0, 2048 }
  0x1e   : > { %p759_p7 = scmp.lt.u32.totalorder %s995_s21, %s1194_s0  ;;  %p760_p10 = scmp.lt.u32.totalorder %s758_s5, %s753_s3 }
  0x1f   : > { %p756_p5 = pnand %p755_p3, %p754_p4  ;;  %p762_p13 = scmp.lt.u32.totalorder %s753_s3, %s995_s21 }
  0x20   : > { %p761_p11 = por %p760_p10, %p759_p7 }
  0x21   : > { %p757_p6 = pneg %p756_p5 }
  0x22   : > { %p763_p1 = por %p762_p13, %p761_p11 }
  0x24   : > { %p764_p2 = pnand %p763_p1, %p757_p6 }
  0x26   : > { %767 = shalt.err (!%p764_p2)
}
  0x27   : > { %s768_s29 = scalar_lea.vmem %s984_s7, 512  ;;  %s883_s17 = smov [#allocation2]  }
  0x28   : > { %p769_p4 = scmp.ne.s32.totalorder %s984_s7, %s768_s29  ;;  %s773_s22 = sshll.u32 %s883_s17, 4  ;;  %s774_s22 = int_to_ptr.vmem [resolvable:$false] %s773_s22 }
  0x29   : > { %s775_s26 = scalar_lea.vmem %s774_s22, 1024  ;;  %p776_p9 = scmp.lt.s32.totalorder %s984_s7, %s774_s22 }
  0x2a   : > { %p771_p5 = pnand %p769_p4, %p755_p3  ;;  %p777_p7 = scmp.lt.s32.totalorder %s775_s26, %s768_s29 }
  0x2c   : > { %p772_p12 = pneg %p771_p5  ;;  %p778_p10 = por %p777_p7, %p776_p9 }
  0x2e   : > { %p779_p11 = pnand %p778_p10, %p772_p12 }
  0x30   : > { %782 = shalt.err (!%p779_p11)
}
  0x31   : > { %678 = dma.hbm_to_vmem [thread:$0]  (!%p988_p0), %s995_s21, 512, %s984_s7, %s129_s27  }
  0x32   : > { %p1203_p1 = scmp.lt.s32.totalorder %s881_s16, 5  ;;  %p1204_p2 = scmp.ge.s32.totalorder %s881_s16, 1 }
  0x34   : > { %p148_p3 = pnand %p1204_p2, %p1203_p1 }
  0x35   : > { %s1029_s3 = sand.u32 (!%p148_p3), 1, %s857_s10  }
  0x36   : > { %151 = sbr.rel (%p148_p3) target bundleno = 225 (0xe1), region = 28  ;;  %s663_s23 = sshll.u32 (!%p148_p3), %s1029_s3, 5 }
  0x37   : > { %s154_s4 = scalar_lea.sflag (!%p148_p3), [#allocation3], %s1029_s3  ;;  %s157_s5 = scalar_lea.vmem (!%p148_p3), [#allocation2], %s663_s23 }
  0x3d   : > { %844 = dma.done.wait (%p963_p8), %s154_s4, 512  }
  0x3e   : > { %846 = vsyncadd (%p963_p8), %s154_s4, 4294966784  ;;  %v884_v0 = vmov 0   ;;  %v184_v1 = vld [vmem:[%s1195_s1] sm:$0xff]  ;;  %v885_v2 = vmov 1   ;;  %v194_v3 = vlaneseq  ;;  %v1040_v10 = vld [vmem:[%s157_s5 + $0x8] sm:$0xff]  ;;  %s664_s24 = sshll.u32 %s1029_s3, 7 }
  0x3f   : > { %751 = vset.pattern.permute.xlu0 %v884_v0  ;;  %v180_v9 = vld [vmem:[%s157_s5] sm:$0xff]  ;;  %v1050_v15 = vld [vmem:[%s157_s5 + $0x10] sm:$0xff]  ;;  %v1052_v16 = vld [vmem:[%s157_s5 + $0x18] sm:$0xff]  ;;  %s666_s21 = sshll.u32 %s865_s12, 4  ;;  %s667_s27 = sshll.u32 %s869_s13, 5 }
  0x40   : > { %187 = vperm.xlu0 %751, %v184_v1   ;;  %v195_v4 = vshrl.u32 %v194_v3, 7  ;;  %s1113_s6 = sadd.s32 %s667_s27, %s666_s21  ;;  %s1118_s13 = scalar_lea.vmem [#allocation5], %s664_s24 }
  0x41   : > { %s668_s12 = sshll.u32 %s1113_s6, 7  ;;  %s567_s8 = sshll.u32 %s1118_s13, 4  ;;  %s1134_s8 = int_to_ptr.vmem [resolvable:$true] %s567_s8 }
  0x42   : > { %v196_v5 = vsub.s32 0, %v195_v4  ;;  %v200_v6 = vsub.s32 2, %v195_v4  ;;  %v204_v7 = vsub.s32 4, %v195_v4  ;;  %v208_v8 = vsub.s32 6, %v195_v4  ;;  %s1132_s22 = scalar_lea.hbm %s1196_s2, %s668_s12  ;;  %s551_s26 = scalar_lea.sflag [#allocation4], %s1029_s3 }
  0x43   : > { %v1042_v11 = vsub.s32 1, %v195_v4  ;;  %v1044_v12 = vsub.s32 3, %v195_v4  ;;  %v1046_v13 = vsub.s32 5, %v195_v4  ;;  %v1048_v14 = vsub.s32 7, %v195_v4  ;;  %s783_s23 = scalar_lea.vmem %s1134_s8, 2048  ;;  %p1205_p9 = scmp.ne.s32.totalorder %s1200_s25, 0 }
  0x44   : > { %752 = vset.pattern.permute.xlu0 %v885_v2  ;;  %v197_v17 = vrot.slane %v180_v9, %v196_v5  ;;  %v201_v18 = vrot.slane %v180_v9, %v200_v6  ;;  %v205_v19 = vrot.slane %v180_v9, %v204_v7  ;;  %v209_v20 = vrot.slane %v180_v9, %v208_v8  ;;  %p784_p8 = scmp.ne.s32.totalorder %s1134_s8, %s783_s23  ;;  %s886_s4 = smov [#allocation5]  }
  0x45   : > { %355 = vperm.xlu0 %752, %v184_v1   ;;  %v213_v21 = vrot.slane %v1040_v10, %v196_v5  ;;  %v217_v22 = vrot.slane %v1040_v10, %v200_v6  ;;  %v221_v23 = vrot.slane %v1040_v10, %v204_v7  ;;  %v225_v24 = vrot.slane %v1040_v10, %v208_v8  ;;  %s787_s5 = sshll.u32 %s886_s4, 4  ;;  %s788_s5 = int_to_ptr.vmem [resolvable:$false] %s787_s5 }
  0x46   : > { %v229_v25 = vrot.slane %v1050_v15, %v196_v5  ;;  %v233_v26 = vrot.slane %v1050_v15, %v200_v6  ;;  %v237_v27 = vrot.slane %v1050_v15, %v204_v7  ;;  %v241_v28 = vrot.slane %v1050_v15, %v208_v8  ;;  %p785_p12 = pnand %p784_p8, %p1205_p9  ;;  %s789_s7 = scalar_lea.vmem %s788_s5, 4096 }
  0x47   : > { %v245_v29 = vrot.slane %v1052_v16, %v196_v5  ;;  %v249_v30 = vrot.slane %v1052_v16, %v200_v6  ;;  %v253_v31 = vrot.slane %v1052_v16, %v204_v7  ;;  %v257_v32 = vrot.slane %v1052_v16, %v208_v8  ;;  %p790_p6 = scmp.lt.s32.totalorder %s1134_s8, %s788_s5  ;;  %p791_p13 = scmp.lt.s32.totalorder %s789_s7, %s783_s23 }
  0x48   : > { %v277_v33 = vrot.slane %v197_v17, %v196_v5  ;;  %v281_v34 = vrot.slane %v201_v18, %v196_v5  ;;  %v285_v35 = vrot.slane %v205_v19, %v196_v5  ;;  %v289_v36 = vrot.slane %v209_v20, %v196_v5  ;;  %p786_p0 = pneg %p785_p12 }
  0x49   : > { %v293_v37 = vrot.slane %v213_v21, %v196_v5  ;;  %v297_v38 = vrot.slane %v217_v22, %v196_v5  ;;  %v301_v39 = vrot.slane %v221_v23, %v196_v5  ;;  %v305_v40 = vrot.slane %v225_v24, %v196_v5  ;;  %p792_p4 = por %p791_p13, %p790_p6 }
  0x4a   : > { %v309_v41 = vrot.slane %v229_v25, %v196_v5  ;;  %v313_v42 = vrot.slane %v233_v26, %v196_v5  ;;  %v317_v43 = vrot.slane %v237_v27, %v196_v5  ;;  %v321_v44 = vrot.slane %v241_v28, %v196_v5 }
  0x4b   : > { %v325_v45 = vrot.slane %v245_v29, %v196_v5  ;;  %v329_v46 = vrot.slane %v249_v30, %v196_v5  ;;  %v333_v47 = vrot.slane %v253_v31, %v196_v5  ;;  %v337_v48 = vrot.slane %v257_v32, %v196_v5  ;;  %p793_p5 = pnand %p792_p4, %p786_p0 }
  0x4c   : > { %v361_v49 = vrot.slane %v180_v9, %v1042_v11  ;;  %v365_v50 = vrot.slane %v180_v9, %v1044_v12  ;;  %v369_v51 = vrot.slane %v180_v9, %v1046_v13  ;;  %v373_v52 = vrot.slane %v180_v9, %v1048_v14 }
  0x4d   : > { %v377_v53 = vrot.slane %v1040_v10, %v1042_v11  ;;  %v381_v54 = vrot.slane %v1040_v10, %v1044_v12  ;;  %v385_v55 = vrot.slane %v1040_v10, %v1046_v13  ;;  %v389_v56 = vrot.slane %v1040_v10, %v1048_v14 }
  0x4e   : > { %v393_v57 = vrot.slane %v1050_v15, %v1042_v11  ;;  %v397_v58 = vrot.slane %v1050_v15, %v1044_v12  ;;  %v401_v59 = vrot.slane %v1050_v15, %v1046_v13  ;;  %v405_v60 = vrot.slane %v1050_v15, %v1048_v14 }
  0x4f   : > { %v409_v61 = vrot.slane %v1052_v16, %v1042_v11  ;;  %v413_v62 = vrot.slane %v1052_v16, %v1044_v12  ;;  %v417_v63 = vrot.slane %v1052_v16, %v1046_v13  ;;  %v421_v0 = vrot.slane %v1052_v16, %v1048_v14 }
  0x50   : > { %v441_v1 = vrot.slane %v361_v49, %v1042_v11  ;;  %v445_v2 = vrot.slane %v365_v50, %v1042_v11  ;;  %v449_v3 = vrot.slane %v369_v51, %v1042_v11  ;;  %v453_v4 = vrot.slane %v373_v52, %v1042_v11 }
  0x51   : > { %v457_v5 = vrot.slane %v377_v53, %v1042_v11  ;;  %v461_v6 = vrot.slane %v381_v54, %v1042_v11  ;;  %v465_v7 = vrot.slane %v385_v55, %v1042_v11  ;;  %v469_v8 = vrot.slane %v389_v56, %v1042_v11 }
  0x52   : > { %v473_v10 = vrot.slane %v393_v57, %v1042_v11  ;;  %v477_v12 = vrot.slane %v397_v58, %v1042_v11  ;;  %v481_v13 = vrot.slane %v401_v59, %v1042_v11  ;;  %v485_v14 = vrot.slane %v405_v60, %v1042_v11 }
  0x53   : > { %v489_v15 = vrot.slane %v409_v61, %v1042_v11  ;;  %v493_v16 = vrot.slane %v413_v62, %v1042_v11  ;;  %v497_v17 = vrot.slane %v417_v63, %v1042_v11  ;;  %v501_v18 = vrot.slane %v421_v0, %v1042_v11 }
  0xbf   : > { %v188_v9 = vpop.permute.xlu0 %187 }
  0xc0   : > { %v338_v19 = vmul.f32 %v277_v33, %v188_v9  ;;  %v339_v20 = vmul.f32 %v281_v34, %v188_v9  ;;  %v340_v21 = vmul.f32 %v285_v35, %v188_v9  ;;  %v341_v22 = vmul.f32 %v289_v36, %v188_v9 }
  0xc1   : > { %v342_v23 = vmul.f32 %v293_v37, %v188_v9  ;;  %v343_v24 = vmul.f32 %v297_v38, %v188_v9  ;;  %v344_v25 = vmul.f32 %v301_v39, %v188_v9  ;;  %v345_v26 = vmul.f32 %v305_v40, %v188_v9 }
  0xc2   : > { %v346_v27 = vmul.f32 %v309_v41, %v188_v9  ;;  %v347_v28 = vmul.f32 %v313_v42, %v188_v9  ;;  %v348_v29 = vmul.f32 %v317_v43, %v188_v9  ;;  %v349_v30 = vmul.f32 %v321_v44, %v188_v9 }
  0xc3   : > { %v350_v32 = vmul.f32 %v325_v45, %v188_v9  ;;  %v351_v49 = vmul.f32 %v329_v46, %v188_v9  ;;  %v352_v50 = vmul.f32 %v333_v47, %v188_v9  ;;  %v353_v11 = vmul.f32 %v337_v48, %v188_v9 }
  0xc4   : > { %v356_v31 = vpop.permute.xlu0 %355 }
  0xc5   : > { %v502_v33 = vmul.f32 %v441_v1, %v356_v31  ;;  %v503_v34 = vmul.f32 %v445_v2, %v356_v31  ;;  %v504_v35 = vmul.f32 %v449_v3, %v356_v31  ;;  %v505_v36 = vmul.f32 %v453_v4, %v356_v31 }
  0xc6   : > { %v506_v51 = vmul.f32 %v457_v5, %v356_v31  ;;  %v507_v37 = vmul.f32 %v461_v6, %v356_v31  ;;  %v508_v38 = vmul.f32 %v465_v7, %v356_v31  ;;  %v509_v39 = vmul.f32 %v469_v8, %v356_v31 }
  0xc7   : > { %v510_v40 = vmul.f32 %v473_v10, %v356_v31  ;;  %v511_v41 = vmul.f32 %v477_v12, %v356_v31  ;;  %v512_v42 = vmul.f32 %v481_v13, %v356_v31  ;;  %v513_v43 = vmul.f32 %v485_v14, %v356_v31 }
  0xc8   : > { %v514_v44 = vmul.f32 %v489_v15, %v356_v31  ;;  %v515_v45 = vmul.f32 %v493_v16, %v356_v31  ;;  %v516_v46 = vmul.f32 %v497_v17, %v356_v31  ;;  %v517_v47 = vmul.f32 %v501_v18, %v356_v31 }
  0xc9   : > { %v518_v48 = vadd.f32 %v502_v33, %v338_v19  ;;  %v519_v52 = vadd.f32 %v503_v34, %v339_v20  ;;  %v520_v53 = vadd.f32 %v504_v35, %v340_v21  ;;  %v521_v54 = vadd.f32 %v505_v36, %v341_v22 }
  0xca   : > { %v522_v55 = vadd.f32 %v506_v51, %v342_v23  ;;  %v523_v56 = vadd.f32 %v507_v37, %v343_v24  ;;  %v524_v57 = vadd.f32 %v508_v38, %v344_v25  ;;  %v525_v58 = vadd.f32 %v509_v39, %v345_v26 }
  0xcb   : > { %v526_v59 = vadd.f32 %v510_v40, %v346_v27  ;;  %v527_v60 = vadd.f32 %v511_v41, %v347_v28  ;;  %v528_v61 = vadd.f32 %v512_v42, %v348_v29  ;;  %v529_v62 = vadd.f32 %v513_v43, %v349_v30  ;;  %534 = vst [vmem:[%s1118_s13] sm:$0xff] %v518_v48 }
  0xcc   : > { %535 = vst [vmem:[%s1118_s13 + $0x8] sm:$0xff] %v519_v52  ;;  %536 = vst [vmem:[%s1118_s13 + $0x10] sm:$0xff] %v520_v53  ;;  %v530_v63 = vadd.f32 %v514_v44, %v350_v32  ;;  %v531_v0 = vadd.f32 %v515_v45, %v351_v49  ;;  %v532_v1 = vadd.f32 %v516_v46, %v352_v50 }
  0xcd   : > { %537 = vst [vmem:[%s1118_s13 + $0x18] sm:$0xff] %v521_v54  ;;  %v533_v2 = vadd.f32 %v517_v47, %v353_v11  ;;  %538 = vst [vmem:[%s1118_s13 + $0x20] sm:$0xff] %v522_v55 }
  0xce   : > { %539 = vst [vmem:[%s1118_s13 + $0x28] sm:$0xff] %v523_v56  ;;  %540 = vst [vmem:[%s1118_s13 + $0x30] sm:$0xff] %v524_v57 }
  0xcf   : > { %541 = vst [vmem:[%s1118_s13 + $0x38] sm:$0xff] %v525_v58  ;;  %542 = vst [vmem:[%s1118_s13 + $0x40] sm:$0xff] %v526_v59 }
  0xd0   : > { %543 = vst [vmem:[%s1118_s13 + $0x48] sm:$0xff] %v527_v60  ;;  %544 = vst [vmem:[%s1118_s13 + $0x50] sm:$0xff] %v528_v61 }
  0xd1   : > { %545 = vst [vmem:[%s1118_s13 + $0x58] sm:$0xff] %v529_v62  ;;  %546 = vst [vmem:[%s1118_s13 + $0x60] sm:$0xff] %v530_v63 }
  0xd2   : > { %547 = vst [vmem:[%s1118_s13 + $0x68] sm:$0xff] %v531_v0  ;;  %548 = vst [vmem:[%s1118_s13 + $0x70] sm:$0xff] %v532_v1 }
  0xd3   : > { %549 = vst [vmem:[%s1118_s13 + $0x78] sm:$0xff] %v533_v2 }
  0xd4   : > { %796 = shalt.err (!%p793_p5)
}
  0xd5   : > { %s797_s3 = scalar_lea.hbm %s1132_s22, 2048  ;;  %s801_s21 = scalar_lea.hbm %s1196_s2, 8192 }
  0xd6   : > { %p798_p7 = scmp.ne.s32.totalorder %s1132_s22, %s797_s3  ;;  %p802_p1 = scmp.lt.u32.totalorder %s1132_s22, %s1196_s2 }
  0xd7   : > { %p803_p2 = scmp.lt.u32.totalorder %s801_s21, %s797_s3  ;;  %p805_p8 = scmp.lt.u32.totalorder %s797_s3, %s1132_s22 }
  0xd8   : > { %p799_p10 = pnand %p798_p7, %p1205_p9 }
  0xd9   : > { %p804_p3 = por %p803_p2, %p802_p1 }
  0xda   : > { %p800_p11 = pneg %p799_p10 }
  0xdb   : > { %p806_p12 = por %p805_p8, %p804_p3 }
  0xdd   : > { %p807_p0 = pnand %p806_p12, %p800_p11 }
  0xdf   : > { %810 = shalt.err (!%p807_p0)
}
  0xe0   : > { %673 = dma.vmem_to_hbm [thread:$0]  (%p1205_p9), %s1134_s8, 2048, %s1132_s22, %s551_s26  }
  0xe1 PF: > { %p684_p6 = scmp.ge.s32.totalorder %s881_s16, 2  ;;  %s579_s12 = sand.u32 1, %s853_s9  }
  0xe2   : > { %p1206_p13 = scmp.ne.s32.totalorder %s1201_s28, 0  ;;  %s580_s13 = scalar_lea.sflag [#allocation4], %s579_s12 }
  0xe4   : > { %p680_p4 = pnand %p684_p6, %p1206_p13 }
  0xe6   : > { %848 = dma.done.wait (!%p680_p4), %s580_s13, 2048  }
  0xe7   : > { %850 = vsyncadd (!%p680_p4), %s580_s13, 4294965248  ;;  %s18_s16 = sadd.s32 1, %s881_s16   ;;  %s1207_s9 = smov %s857_s10 }
  0xe8   : > { %p15_p5 = scmp.ge.s32.totalorder %s18_s16, 6   ;;  %s1208_s10 = smov %s861_s11 }
  0xe9   : > { %s1209_s11 = smov %s980_s30  ;;  %s1210_s12 = smov %s873_s14 }
  0xea   : > { %s1211_s13 = smov %s877_s15  ;;  %s1212_s14 = smov %s1215_s19 }
  0xeb   : > { %s1213_s15 = smov %s1219_s20  ;;  %17 = sbr.rel (!%p15_p5) target bundleno = 7 (0x7), region = 73 }
  0xf2   :  { %585 = vsyncpa [#allocation3], 1 }
  0xf3   :  { %587 = vsyncpa [#allocation3 + $0x1], 1 }
  0xf4   :  { %588 = vsyncpa [#allocation4], 1 }
  0xf5   :  { %590 = vsyncpa [#allocation4 + $0x1], 1 }

</bundles_post_ra>
